<compile_context>
chip_gen: v7x
topology: tpu7x:2x2x1
jax: 0.10.0
libtpu: 0.0.40
codegen_flags: <defaults>
</compile_context>

<pallas_src>
import jax
import jax.numpy as jnp
from jax import lax
from jax.experimental import pallas as pl
from jax.experimental.pallas import tpu as pltpu


def lstm_fc_kernel(x_ref, wih_ref, whh_ref, b_ref, fcw_ref, fcb_ref,
                   out_ref, xw_ref):
    # x_ref  : (T*B, Din)   time-major, flattened over (T, B)
    # wih_ref: (Din, 4H)    fused gate columns ordered i|f|g|o
    # whh_ref: (H,   4H)
    # b_ref  : (1,   4H)    b_ih + b_hh combined
    # fcw_ref: (H, C)
    # fcb_ref: (1, C)
    # out_ref: (B, C)
    # xw_ref : (T*B, 4H)    VMEM scratch (precomputed input projection)
    TB = x_ref.shape[0]
    B = out_ref.shape[0]
    H4 = whh_ref.shape[1]
    H = H4 // 4
    T = TB // B

    # ---- Prologue: one lane-dense matmul for the whole sequence ----------
    # (T*B, Din) @ (Din, 4H) + (1, 4H); bias broadcast happens once here.
    xw_ref[...] = (
        jnp.dot(x_ref[...], wih_ref[...], preferred_element_type=jnp.float32)
        + b_ref[...]
    )

    whh = whh_ref[...]  # (H, 4H) — small; keep in vregs across the loop

    h0 = jnp.zeros((B, H), jnp.float32)
    c0 = jnp.zeros((B, H), jnp.float32)

    # ---- Serial recurrence: only h @ Whh sits on the critical path -------
    def step(t, carry):
        h, c = carry
        base = pl.multiple_of(t * B, B)
        gates = xw_ref[pl.ds(base, B), :] + jnp.dot(
            h, whh, preferred_element_type=jnp.float32)      # (B, 4H)

        sig = jax.nn.sigmoid(gates)            # one full-vreg EUP pass (i,f,-,o)
        i_g = sig[:, 0 * H:1 * H]
        f_g = sig[:, 1 * H:2 * H]
        o_g = sig[:, 3 * H:4 * H]
        g_g = jnp.tanh(gates[:, 2 * H:3 * H])

        c_new = f_g * c + i_g * g_g
        h_new = o_g * jnp.tanh(c_new)
        return (h_new, c_new)

    # T is static -> fully unroll so MXU/EUP/VPU work overlaps across steps.
    h_T, _ = lax.fori_loop(0, T, step, (h0, c0), unroll=True)

    # ---- Head: ReLU + Linear ---------------------------------------------
    relu_h = jnp.maximum(h_T, 0.0)
    out_ref[...] = (
        jnp.dot(relu_h, fcw_ref[...], preferred_element_type=jnp.float32)
        + fcb_ref[...]
    )


def water_level_lstm_forward(x_btd, w_ih, w_hh, b_ih, b_hh, fc_w, fc_b):
    """x_btd: (B, T, Din) float32 (batch_first, like PyTorch).

    w_ih: (4H, Din), w_hh: (4H, H), b_ih/b_hh: (4H,)  -- PyTorch LSTM params
    fc_w: (C, H), fc_b: (C,)                           -- PyTorch Linear params
    Returns (B, C) float32.
    """
    B, T, Din = x_btd.shape
    H4 = w_ih.shape[0]
    H = H4 // 4
    C = fc_w.shape[0]

    # Time-major, then flatten (T, B) so the input projection is one matmul.
    x_tb = (jnp.transpose(x_btd, (1, 0, 2))
            .reshape(T * B, Din).astype(jnp.float32))          # (T*B, Din)
    # Fused-gate, lane-dense weight layouts: columns ordered i|f|g|o (4H=128).
    wih_k = jnp.transpose(w_ih, (1, 0)).astype(jnp.float32)    # (Din, 4H)
    whh_k = jnp.transpose(w_hh, (1, 0)).astype(jnp.float32)    # (H,   4H)
    b_k = (b_ih + b_hh).reshape(1, H4).astype(jnp.float32)     # (1,   4H)
    fcw_k = jnp.transpose(fc_w, (1, 0)).astype(jnp.float32)    # (H, C)
    fcb_k = fc_b.reshape(1, C).astype(jnp.float32)             # (1, C)

    vmem = pl.BlockSpec(memory_space=pltpu.MemorySpace.VMEM)
    out = pl.pallas_call(
        lstm_fc_kernel,
        out_shape=jax.ShapeDtypeStruct((B, C), jnp.float32),
        in_specs=[vmem] * 6,
        out_specs=vmem,
        scratch_shapes=[pltpu.VMEM((T * B, H4), jnp.float32)],
    )(x_tb, wih_k, whh_k, b_k, fcw_k, fcb_k)
    return out


def reference_forward(x_btd, w_ih, w_hh, b_ih, b_hh, fc_w, fc_b):
    """Pure-JAX reference matching PyTorch nn.LSTM + ReLU + Linear."""
    B, T, Din = x_btd.shape
    H = w_hh.shape[1]
    h = jnp.zeros((B, H), jnp.float32)
    c = jnp.zeros((B, H), jnp.float32)
    for t in range(T):
        x_t = x_btd[:, t, :]
        gates = x_t @ w_ih.T + b_ih + h @ w_hh.T + b_hh
        i = jax.nn.sigmoid(gates[:, 0 * H:1 * H])
        f = jax.nn.sigmoid(gates[:, 1 * H:2 * H])
        g = jnp.tanh(gates[:, 2 * H:3 * H])
        o = jax.nn.sigmoid(gates[:, 3 * H:4 * H])
        c = f * c + i * g
        h = o * jnp.tanh(c)
    return jnp.maximum(h, 0.0) @ fc_w.T + fc_b


if __name__ == "__main__":
    # Small shapes consistent with the module (LSTM over a sequence, final
    # hidden -> ReLU -> Linear).  H=32 so the fused gate width 4H = 128
    # exactly fills one lane.
    B, T, Din, H, C = 8, 8, 16, 32, 16

    key = jax.random.PRNGKey(0)
    ks = jax.random.split(key, 7)
    scale = 1.0 / jnp.sqrt(H)  # PyTorch-style uniform(-1/sqrt(H), 1/sqrt(H))

    x = jax.random.normal(ks[0], (B, T, Din), jnp.float32)
    w_ih = jax.random.uniform(ks[1], (4 * H, Din), jnp.float32, -scale, scale)
    w_hh = jax.random.uniform(ks[2], (4 * H, H), jnp.float32, -scale, scale)
    b_ih = jax.random.uniform(ks[3], (4 * H,), jnp.float32, -scale, scale)
    b_hh = jax.random.uniform(ks[4], (4 * H,), jnp.float32, -scale, scale)
    fc_w = jax.random.uniform(ks[5], (C, H), jnp.float32, -scale, scale)
    fc_b = jax.random.uniform(ks[6], (C,), jnp.float32, -scale, scale)

    out = water_level_lstm_forward(x, w_ih, w_hh, b_ih, b_hh, fc_w, fc_b)
    out = jax.block_until_ready(out)

    ref = reference_forward(x, w_ih, w_hh, b_ih, b_hh, fc_w, fc_b)
    assert out.shape == (B, C)
    assert jnp.allclose(out, ref, atol=1e-4, rtol=1e-4), (
        f"max abs err {jnp.max(jnp.abs(out - ref))}")

    print("KERNEL_OK")
</pallas_src>

<mosaic_0001>
module attributes {stable_mosaic.version = 11 : i64} {
  func.func @lstm_fc_kernel(%arg0: memref<64x16xf32, #tpu.memory_space<vmem>>, %arg1: memref<16x128xf32, #tpu.memory_space<vmem>>, %arg2: memref<32x128xf32, #tpu.memory_space<vmem>>, %arg3: memref<1x128xf32, #tpu.memory_space<vmem>>, %arg4: memref<32x16xf32, #tpu.memory_space<vmem>>, %arg5: memref<1x16xf32, #tpu.memory_space<vmem>>, %arg6: memref<8x16xf32, #tpu.memory_space<vmem>>, %arg7: memref<64x128xf32, #tpu.memory_space<vmem>>) attributes {dimension_semantics = [], scalar_prefetch = 0 : i64, scratch_operands = 1 : i64, tpu.core_type = #tpu.core_type<tc>} {
    %c0 = arith.constant 0 : index
    %c0_0 = arith.constant 0 : index
    %0 = vector.load %arg0[%c0, %c0_0] : memref<64x16xf32, #tpu.memory_space<vmem>>, vector<64x16xf32>
    %c0_1 = arith.constant 0 : index
    %c0_2 = arith.constant 0 : index
    %1 = vector.load %arg1[%c0_1, %c0_2] : memref<16x128xf32, #tpu.memory_space<vmem>>, vector<16x128xf32>
    %cst = arith.constant dense<0.000000e+00> : vector<64x128xf32>
    %2 = tpu.matmul %0, %1, %cst {dimension_numbers = #tpu.dot_dimension_numbers<[1], [0], [0], [1], [0, 0, 1, 1], [], []>} : vector<64x16xf32>, vector<16x128xf32>, vector<64x128xf32> -> vector<64x128xf32>
    %c0_3 = arith.constant 0 : index
    %c0_4 = arith.constant 0 : index
    %3 = vector.load %arg3[%c0_3, %c0_4] : memref<1x128xf32, #tpu.memory_space<vmem>>, vector<1x128xf32>
    %4 = vector.broadcast %3 : vector<1x128xf32> to vector<64x128xf32>
    %5 = arith.addf %2, %4 : vector<64x128xf32>
    %c0_5 = arith.constant 0 : index
    %c0_6 = arith.constant 0 : index
    %6 = vector.load %arg7[%c0_5, %c0_6] : memref<64x128xf32, #tpu.memory_space<vmem>>, vector<64x128xf32>
    tpu.vector_store %arg7[%c0_5, %c0_6], %5 {strides = array<i32>} : memref<64x128xf32, #tpu.memory_space<vmem>>, vector<64x128xf32>,
    %c0_7 = arith.constant 0 : index
    %c0_8 = arith.constant 0 : index
    %7 = vector.load %arg2[%c0_7, %c0_8] : memref<32x128xf32, #tpu.memory_space<vmem>>, vector<32x128xf32>
    %cst_9 = arith.constant 0.000000e+00 : f32
    %8 = vector.broadcast %cst_9 : f32 to vector<8x32xf32>
    %cst_10 = arith.constant 0.000000e+00 : f32
    %9 = vector.broadcast %cst_10 : f32 to vector<8x32xf32>
    %c0_i32 = arith.constant 0 : i32
    %c8_i32 = arith.constant 8 : i32
    %10 = arith.muli %c0_i32, %c8_i32 : i32
    %11 = tpu.assume_multiple %10, 8 : i32
    %12 = arith.index_cast %11 : i32 to index
    %c0_11 = arith.constant 0 : index
    %13 = vector.load %arg7[%12, %c0_11] : memref<64x128xf32, #tpu.memory_space<vmem>>, vector<8x128xf32>
    %cst_12 = arith.constant dense<0.000000e+00> : vector<8x128xf32>
    %14 = tpu.matmul %8, %7, %cst_12 {dimension_numbers = #tpu.dot_dimension_numbers<[1], [0], [0], [1], [0, 0, 1, 1], [], []>} : vector<8x32xf32>, vector<32x128xf32>, vector<8x128xf32> -> vector<8x128xf32>
    %15 = arith.addf %13, %14 : vector<8x128xf32>
    %16 = arith.negf %15 : vector<8x128xf32>
    %17 = math.exp %16 : vector<8x128xf32>
    %cst_13 = arith.constant 1.000000e+00 : f32
    %18 = vector.broadcast %cst_13 : f32 to vector<8x128xf32>
    %19 = arith.addf %18, %17 : vector<8x128xf32>
    %20 = arith.divf %18, %19 : vector<8x128xf32>
    %21 = vector.extract_strided_slice %20 {offsets = [0, 0], sizes = [8, 32], strides = [1, 1]} : vector<8x128xf32> to vector<8x32xf32>
    %22 = vector.extract_strided_slice %20 {offsets = [0, 32], sizes = [8, 32], strides = [1, 1]} : vector<8x128xf32> to vector<8x32xf32>
    %23 = vector.extract_strided_slice %20 {offsets = [0, 96], sizes = [8, 32], strides = [1, 1]} : vector<8x128xf32> to vector<8x32xf32>
    %24 = vector.extract_strided_slice %15 {offsets = [0, 64], sizes = [8, 32], strides = [1, 1]} : vector<8x128xf32> to vector<8x32xf32>
    %25 = math.tanh %24 : vector<8x32xf32>
    %26 = arith.mulf %22, %9 : vector<8x32xf32>
    %27 = arith.mulf %21, %25 : vector<8x32xf32>
    %28 = arith.addf %26, %27 : vector<8x32xf32>
    %29 = math.tanh %28 : vector<8x32xf32>
    %30 = arith.mulf %23, %29 : vector<8x32xf32>
    %c1_i32 = arith.constant 1 : i32
    %c8_i32_14 = arith.constant 8 : i32
    %31 = arith.muli %c1_i32, %c8_i32_14 : i32
    %32 = tpu.assume_multiple %31, 8 : i32
    %33 = arith.index_cast %32 : i32 to index
    %c0_15 = arith.constant 0 : index
    %34 = vector.load %arg7[%33, %c0_15] : memref<64x128xf32, #tpu.memory_space<vmem>>, vector<8x128xf32>
    %cst_16 = arith.constant dense<0.000000e+00> : vector<8x128xf32>
    %35 = tpu.matmul %30, %7, %cst_16 {dimension_numbers = #tpu.dot_dimension_numbers<[1], [0], [0], [1], [0, 0, 1, 1], [], []>} : vector<8x32xf32>, vector<32x128xf32>, vector<8x128xf32> -> vector<8x128xf32>
    %36 = arith.addf %34, %35 : vector<8x128xf32>
    %37 = arith.negf %36 : vector<8x128xf32>
    %38 = math.exp %37 : vector<8x128xf32>
    %cst_17 = arith.constant 1.000000e+00 : f32
    %39 = vector.broadcast %cst_17 : f32 to vector<8x128xf32>
    %40 = arith.addf %39, %38 : vector<8x128xf32>
    %41 = arith.divf %39, %40 : vector<8x128xf32>
    %42 = vector.extract_strided_slice %41 {offsets = [0, 0], sizes = [8, 32], strides = [1, 1]} : vector<8x128xf32> to vector<8x32xf32>
    %43 = vector.extract_strided_slice %41 {offsets = [0, 32], sizes = [8, 32], strides = [1, 1]} : vector<8x128xf32> to vector<8x32xf32>
    %44 = vector.extract_strided_slice %41 {offsets = [0, 96], sizes = [8, 32], strides = [1, 1]} : vector<8x128xf32> to vector<8x32xf32>
    %45 = vector.extract_strided_slice %36 {offsets = [0, 64], sizes = [8, 32], strides = [1, 1]} : vector<8x128xf32> to vector<8x32xf32>
    %46 = math.tanh %45 : vector<8x32xf32>
    %47 = arith.mulf %43, %28 : vector<8x32xf32>
    %48 = arith.mulf %42, %46 : vector<8x32xf32>
    %49 = arith.addf %47, %48 : vector<8x32xf32>
    %50 = math.tanh %49 : vector<8x32xf32>
    %51 = arith.mulf %44, %50 : vector<8x32xf32>
    %c2_i32 = arith.constant 2 : i32
    %c8_i32_18 = arith.constant 8 : i32
    %52 = arith.muli %c2_i32, %c8_i32_18 : i32
    %53 = tpu.assume_multiple %52, 8 : i32
    %54 = arith.index_cast %53 : i32 to index
    %c0_19 = arith.constant 0 : index
    %55 = vector.load %arg7[%54, %c0_19] : memref<64x128xf32, #tpu.memory_space<vmem>>, vector<8x128xf32>
    %cst_20 = arith.constant dense<0.000000e+00> : vector<8x128xf32>
    %56 = tpu.matmul %51, %7, %cst_20 {dimension_numbers = #tpu.dot_dimension_numbers<[1], [0], [0], [1], [0, 0, 1, 1], [], []>} : vector<8x32xf32>, vector<32x128xf32>, vector<8x128xf32> -> vector<8x128xf32>
    %57 = arith.addf %55, %56 : vector<8x128xf32>
    %58 = arith.negf %57 : vector<8x128xf32>
    %59 = math.exp %58 : vector<8x128xf32>
    %cst_21 = arith.constant 1.000000e+00 : f32
    %60 = vector.broadcast %cst_21 : f32 to vector<8x128xf32>
    %61 = arith.addf %60, %59 : vector<8x128xf32>
    %62 = arith.divf %60, %61 : vector<8x128xf32>
    %63 = vector.extract_strided_slice %62 {offsets = [0, 0], sizes = [8, 32], strides = [1, 1]} : vector<8x128xf32> to vector<8x32xf32>
    %64 = vector.extract_strided_slice %62 {offsets = [0, 32], sizes = [8, 32], strides = [1, 1]} : vector<8x128xf32> to vector<8x32xf32>
    %65 = vector.extract_strided_slice %62 {offsets = [0, 96], sizes = [8, 32], strides = [1, 1]} : vector<8x128xf32> to vector<8x32xf32>
    %66 = vector.extract_strided_slice %57 {offsets = [0, 64], sizes = [8, 32], strides = [1, 1]} : vector<8x128xf32> to vector<8x32xf32>
    %67 = math.tanh %66 : vector<8x32xf32>
    %68 = arith.mulf %64, %49 : vector<8x32xf32>
    %69 = arith.mulf %63, %67 : vector<8x32xf32>
    %70 = arith.addf %68, %69 : vector<8x32xf32>
    %71 = math.tanh %70 : vector<8x32xf32>
    %72 = arith.mulf %65, %71 : vector<8x32xf32>
    %c3_i32 = arith.constant 3 : i32
    %c8_i32_22 = arith.constant 8 : i32
    %73 = arith.muli %c3_i32, %c8_i32_22 : i32
    %74 = tpu.assume_multiple %73, 8 : i32
    %75 = arith.index_cast %74 : i32 to index
    %c0_23 = arith.constant 0 : index
    %76 = vector.load %arg7[%75, %c0_23] : memref<64x128xf32, #tpu.memory_space<vmem>>, vector<8x128xf32>
    %cst_24 = arith.constant dense<0.000000e+00> : vector<8x128xf32>
    %77 = tpu.matmul %72, %7, %cst_24 {dimension_numbers = #tpu.dot_dimension_numbers<[1], [0], [0], [1], [0, 0, 1, 1], [], []>} : vector<8x32xf32>, vector<32x128xf32>, vector<8x128xf32> -> vector<8x128xf32>
    %78 = arith.addf %76, %77 : vector<8x128xf32>
    %79 = arith.negf %78 : vector<8x128xf32>
    %80 = math.exp %79 : vector<8x128xf32>
    %cst_25 = arith.constant 1.000000e+00 : f32
    %81 = vector.broadcast %cst_25 : f32 to vector<8x128xf32>
    %82 = arith.addf %81, %80 : vector<8x128xf32>
    %83 = arith.divf %81, %82 : vector<8x128xf32>
    %84 = vector.extract_strided_slice %83 {offsets = [0, 0], sizes = [8, 32], strides = [1, 1]} : vector<8x128xf32> to vector<8x32xf32>
    %85 = vector.extract_strided_slice %83 {offsets = [0, 32], sizes = [8, 32], strides = [1, 1]} : vector<8x128xf32> to vector<8x32xf32>
    %86 = vector.extract_strided_slice %83 {offsets = [0, 96], sizes = [8, 32], strides = [1, 1]} : vector<8x128xf32> to vector<8x32xf32>
    %87 = vector.extract_strided_slice %78 {offsets = [0, 64], sizes = [8, 32], strides = [1, 1]} : vector<8x128xf32> to vector<8x32xf32>
    %88 = math.tanh %87 : vector<8x32xf32>
    %89 = arith.mulf %85, %70 : vector<8x32xf32>
    %90 = arith.mulf %84, %88 : vector<8x32xf32>
    %91 = arith.addf %89, %90 : vector<8x32xf32>
    %92 = math.tanh %91 : vector<8x32xf32>
    %93 = arith.mulf %86, %92 : vector<8x32xf32>
    %c4_i32 = arith.constant 4 : i32
    %c8_i32_26 = arith.constant 8 : i32
    %94 = arith.muli %c4_i32, %c8_i32_26 : i32
    %95 = tpu.assume_multiple %94, 8 : i32
    %96 = arith.index_cast %95 : i32 to index
    %c0_27 = arith.constant 0 : index
    %97 = vector.load %arg7[%96, %c0_27] : memref<64x128xf32, #tpu.memory_space<vmem>>, vector<8x128xf32>
    %cst_28 = arith.constant dense<0.000000e+00> : vector<8x128xf32>
    %98 = tpu.matmul %93, %7, %cst_28 {dimension_numbers = #tpu.dot_dimension_numbers<[1], [0], [0], [1], [0, 0, 1, 1], [], []>} : vector<8x32xf32>, vector<32x128xf32>, vector<8x128xf32> -> vector<8x128xf32>
    %99 = arith.addf %97, %98 : vector<8x128xf32>
    %100 = arith.negf %99 : vector<8x128xf32>
    %101 = math.exp %100 : vector<8x128xf32>
    %cst_29 = arith.constant 1.000000e+00 : f32
    %102 = vector.broadcast %cst_29 : f32 to vector<8x128xf32>
    %103 = arith.addf %102, %101 : vector<8x128xf32>
    %104 = arith.divf %102, %103 : vector<8x128xf32>
    %105 = vector.extract_strided_slice %104 {offsets = [0, 0], sizes = [8, 32], strides = [1, 1]} : vector<8x128xf32> to vector<8x32xf32>
    %106 = vector.extract_strided_slice %104 {offsets = [0, 32], sizes = [8, 32], strides = [1, 1]} : vector<8x128xf32> to vector<8x32xf32>
    %107 = vector.extract_strided_slice %104 {offsets = [0, 96], sizes = [8, 32], strides = [1, 1]} : vector<8x128xf32> to vector<8x32xf32>
    %108 = vector.extract_strided_slice %99 {offsets = [0, 64], sizes = [8, 32], strides = [1, 1]} : vector<8x128xf32> to vector<8x32xf32>
    %109 = math.tanh %108 : vector<8x32xf32>
    %110 = arith.mulf %106, %91 : vector<8x32xf32>
    %111 = arith.mulf %105, %109 : vector<8x32xf32>
    %112 = arith.addf %110, %111 : vector<8x32xf32>
    %113 = math.tanh %112 : vector<8x32xf32>
    %114 = arith.mulf %107, %113 : vector<8x32xf32>
    %c5_i32 = arith.constant 5 : i32
    %c8_i32_30 = arith.constant 8 : i32
    %115 = arith.muli %c5_i32, %c8_i32_30 : i32
    %116 = tpu.assume_multiple %115, 8 : i32
    %117 = arith.index_cast %116 : i32 to index
    %c0_31 = arith.constant 0 : index
    %118 = vector.load %arg7[%117, %c0_31] : memref<64x128xf32, #tpu.memory_space<vmem>>, vector<8x128xf32>
    %cst_32 = arith.constant dense<0.000000e+00> : vector<8x128xf32>
    %119 = tpu.matmul %114, %7, %cst_32 {dimension_numbers = #tpu.dot_dimension_numbers<[1], [0], [0], [1], [0, 0, 1, 1], [], []>} : vector<8x32xf32>, vector<32x128xf32>, vector<8x128xf32> -> vector<8x128xf32>
    %120 = arith.addf %118, %119 : vector<8x128xf32>
    %121 = arith.negf %120 : vector<8x128xf32>
    %122 = math.exp %121 : vector<8x128xf32>
    %cst_33 = arith.constant 1.000000e+00 : f32
    %123 = vector.broadcast %cst_33 : f32 to vector<8x128xf32>
    %124 = arith.addf %123, %122 : vector<8x128xf32>
    %125 = arith.divf %123, %124 : vector<8x128xf32>
    %126 = vector.extract_strided_slice %125 {offsets = [0, 0], sizes = [8, 32], strides = [1, 1]} : vector<8x128xf32> to vector<8x32xf32>
    %127 = vector.extract_strided_slice %125 {offsets = [0, 32], sizes = [8, 32], strides = [1, 1]} : vector<8x128xf32> to vector<8x32xf32>
    %128 = vector.extract_strided_slice %125 {offsets = [0, 96], sizes = [8, 32], strides = [1, 1]} : vector<8x128xf32> to vector<8x32xf32>
    %129 = vector.extract_strided_slice %120 {offsets = [0, 64], sizes = [8, 32], strides = [1, 1]} : vector<8x128xf32> to vector<8x32xf32>
    %130 = math.tanh %129 : vector<8x32xf32>
    %131 = arith.mulf %127, %112 : vector<8x32xf32>
    %132 = arith.mulf %126, %130 : vector<8x32xf32>
    %133 = arith.addf %131, %132 : vector<8x32xf32>
    %134 = math.tanh %133 : vector<8x32xf32>
    %135 = arith.mulf %128, %134 : vector<8x32xf32>
    %c6_i32 = arith.constant 6 : i32
    %c8_i32_34 = arith.constant 8 : i32
    %136 = arith.muli %c6_i32, %c8_i32_34 : i32
    %137 = tpu.assume_multiple %136, 8 : i32
    %138 = arith.index_cast %137 : i32 to index
    %c0_35 = arith.constant 0 : index
    %139 = vector.load %arg7[%138, %c0_35] : memref<64x128xf32, #tpu.memory_space<vmem>>, vector<8x128xf32>
    %cst_36 = arith.constant dense<0.000000e+00> : vector<8x128xf32>
    %140 = tpu.matmul %135, %7, %cst_36 {dimension_numbers = #tpu.dot_dimension_numbers<[1], [0], [0], [1], [0, 0, 1, 1], [], []>} : vector<8x32xf32>, vector<32x128xf32>, vector<8x128xf32> -> vector<8x128xf32>
    %141 = arith.addf %139, %140 : vector<8x128xf32>
    %142 = arith.negf %141 : vector<8x128xf32>
    %143 = math.exp %142 : vector<8x128xf32>
    %cst_37 = arith.constant 1.000000e+00 : f32
    %144 = vector.broadcast %cst_37 : f32 to vector<8x128xf32>
    %145 = arith.addf %144, %143 : vector<8x128xf32>
    %146 = arith.divf %144, %145 : vector<8x128xf32>
    %147 = vector.extract_strided_slice %146 {offsets = [0, 0], sizes = [8, 32], strides = [1, 1]} : vector<8x128xf32> to vector<8x32xf32>
    %148 = vector.extract_strided_slice %146 {offsets = [0, 32], sizes = [8, 32], strides = [1, 1]} : vector<8x128xf32> to vector<8x32xf32>
    %149 = vector.extract_strided_slice %146 {offsets = [0, 96], sizes = [8, 32], strides = [1, 1]} : vector<8x128xf32> to vector<8x32xf32>
    %150 = vector.extract_strided_slice %141 {offsets = [0, 64], sizes = [8, 32], strides = [1, 1]} : vector<8x128xf32> to vector<8x32xf32>
    %151 = math.tanh %150 : vector<8x32xf32>
    %152 = arith.mulf %148, %133 : vector<8x32xf32>
    %153 = arith.mulf %147, %151 : vector<8x32xf32>
    %154 = arith.addf %152, %153 : vector<8x32xf32>
    %155 = math.tanh %154 : vector<8x32xf32>
    %156 = arith.mulf %149, %155 : vector<8x32xf32>
    %c7_i32 = arith.constant 7 : i32
    %c8_i32_38 = arith.constant 8 : i32
    %157 = arith.muli %c7_i32, %c8_i32_38 : i32
    %158 = tpu.assume_multiple %157, 8 : i32
    %159 = arith.index_cast %158 : i32 to index
    %c0_39 = arith.constant 0 : index
    %160 = vector.load %arg7[%159, %c0_39] : memref<64x128xf32, #tpu.memory_space<vmem>>, vector<8x128xf32>
    %cst_40 = arith.constant dense<0.000000e+00> : vector<8x128xf32>
    %161 = tpu.matmul %156, %7, %cst_40 {dimension_numbers = #tpu.dot_dimension_numbers<[1], [0], [0], [1], [0, 0, 1, 1], [], []>} : vector<8x32xf32>, vector<32x128xf32>, vector<8x128xf32> -> vector<8x128xf32>
    %162 = arith.addf %160, %161 : vector<8x128xf32>
    %163 = arith.negf %162 : vector<8x128xf32>
    %164 = math.exp %163 : vector<8x128xf32>
    %cst_41 = arith.constant 1.000000e+00 : f32
    %165 = vector.broadcast %cst_41 : f32 to vector<8x128xf32>
    %166 = arith.addf %165, %164 : vector<8x128xf32>
    %167 = arith.divf %165, %166 : vector<8x128xf32>
    %168 = vector.extract_strided_slice %167 {offsets = [0, 0], sizes = [8, 32], strides = [1, 1]} : vector<8x128xf32> to vector<8x32xf32>
    %169 = vector.extract_strided_slice %167 {offsets = [0, 32], sizes = [8, 32], strides = [1, 1]} : vector<8x128xf32> to vector<8x32xf32>
    %170 = vector.extract_strided_slice %167 {offsets = [0, 96], sizes = [8, 32], strides = [1, 1]} : vector<8x128xf32> to vector<8x32xf32>
    %171 = vector.extract_strided_slice %162 {offsets = [0, 64], sizes = [8, 32], strides = [1, 1]} : vector<8x128xf32> to vector<8x32xf32>
    %172 = math.tanh %171 : vector<8x32xf32>
    %173 = arith.mulf %169, %154 : vector<8x32xf32>
    %174 = arith.mulf %168, %172 : vector<8x32xf32>
    %175 = arith.addf %173, %174 : vector<8x32xf32>
    %176 = math.tanh %175 : vector<8x32xf32>
    %177 = arith.mulf %170, %176 : vector<8x32xf32>
    %c8_i32_42 = arith.constant 8 : i32
    %cst_43 = arith.constant 0.000000e+00 : f32
    %178 = vector.broadcast %cst_43 : f32 to vector<8x32xf32>
    %179 = arith.maximumf %177, %178 : vector<8x32xf32>
    %c0_44 = arith.constant 0 : index
    %c0_45 = arith.constant 0 : index
    %180 = vector.load %arg4[%c0_44, %c0_45] : memref<32x16xf32, #tpu.memory_space<vmem>>, vector<32x16xf32>
    %cst_46 = arith.constant dense<0.000000e+00> : vector<8x16xf32>
    %181 = tpu.matmul %179, %180, %cst_46 {dimension_numbers = #tpu.dot_dimension_numbers<[1], [0], [0], [1], [0, 0, 1, 1], [], []>} : vector<8x32xf32>, vector<32x16xf32>, vector<8x16xf32> -> vector<8x16xf32>
    %c0_47 = arith.constant 0 : index
    %c0_48 = arith.constant 0 : index
    %182 = vector.load %arg5[%c0_47, %c0_48] : memref<1x16xf32, #tpu.memory_space<vmem>>, vector<1x16xf32>
    %183 = vector.broadcast %182 : vector<1x16xf32> to vector<8x16xf32>
    %184 = arith.addf %181, %183 : vector<8x16xf32>
    %c0_49 = arith.constant 0 : index
    %c0_50 = arith.constant 0 : index
    %185 = vector.load %arg6[%c0_49, %c0_50] : memref<8x16xf32, #tpu.memory_space<vmem>>, vector<8x16xf32>
    tpu.vector_store %arg6[%c0_49, %c0_50], %184 {strides = array<i32>} : memref<8x16xf32, #tpu.memory_space<vmem>>, vector<8x16xf32>,
    return
  }
}

</mosaic_0001>

<bundles_post_ra>
// kernel: tpu_custom_call.1
= control target key start
LH: loop header
LB: loop body
LE: loop exit
PB: predicated region body
PF: predicated region fallthrough
CT: control target
= control target key end

     0   :  { %vm41_vm0 = vcmask 130048   ;;  %v1447_v3 = vmov 0.0|0.0   ;;  %vm1448_vm1 = vmmov 0   ;;  %v1449_v10 = vmov 0.0   ;;  %s1688_s0 = inlined_call_operand.vmem [shape: f32[64,16], index: 0, kind: input, shape index: {}]   ;;  %s1689_s1 = inlined_call_operand.vmem [shape: f32[16,128], index: 1, kind: input, shape index: {}]   ;;  %s1690_s2 = inlined_call_operand.vmem [shape: f32[32,128], index: 2, kind: input, shape index: {}]   ;;  %s1691_s3 = inlined_call_operand.vmem [shape: f32[1,128], index: 3, kind: input, shape index: {}]   ;;  %s1692_s4 = inlined_call_operand.vmem [shape: f32[32,16], index: 4, kind: input, shape index: {}]   ;;  %s1693_s5 = inlined_call_operand.vmem [shape: f32[1,16], index: 5, kind: input, shape index: {}]   ;;  %s1694_s6 = inlined_call_operand.hbm [shape: f32[8,16], index: 6, kind: output, shape index: {}]  }
   0x1   :  { %v32_v0 = vld [vmem:[%s1689_s1] sm:$0xff]  ;;  %v33_v1 = vld [vmem:[%s1689_s1 + $0x8] sm:$0xff]  ;;  %1299 = vmatprep.subr.bf16.mxu1 %v1447_v3  ;;  %v181_v8 = vld [vmem:[%s1690_s2 + $0x10] sm:$0xff]  ;;  %1204 = vmatprep.mubr.msk.f32.mxu1 %vm1448_vm1, %v1449_v10 }
   0x2   :  { %v179_v2 = vld [vmem:[%s1690_s2] sm:$0xff]  ;;  %v1295_v4 = vpack.c.bf16 %v33_v1, %v32_v0  ;;  %v180_v5 = vld [vmem:[%s1690_s2 + $0x8] sm:$0xff]  ;;  %v182_v9 = vld [vmem:[%s1690_s2 + $0x18] sm:$0xff] }
   0x3   :  { %v24_v6 = vld [vmem:[%s1688_s0] sm:$0xff]  ;;  %v1504_v7 = vpack.c.bf16 %v180_v5, %v179_v2 }
   0x4   :  { %1184 = vmatprep.mubr.msk.f32.mxu0 %vm41_vm0, %v24_v6 }
   0x5   :  { %11 = vsyncpa [#allocation4], 0  ;;  %1296 = vmatprep.subr.bf16.mxu0 %v1295_v4  ;;  %1301 = vmatpush3.bf16.msra.mxu1 %v1504_v7  ;;  %v25_v11 = vld [vmem:[%s1688_s0 + $0x8] sm:$0xff]  ;;  %v1519_v12 = vpack.c.bf16 %v182_v9, %v181_v8  ;;  %v1540_v13 = vld [vmem:[%s1691_s3] ss:$0 sm:$0xff]  ;;  %s1450_s13 = smov 64  }
   0x6   :  { %1298 = vmatpush3.bf16.msra.mxu0 %v1295_v4  ;;  %1302 = vmatprep.subr.bf16.mxu1 %v1447_v3  ;;  %s1451_s3 = smov 32   ;;  %vm184_vm2 = vcmask 261120   ;;  %v26_v48 = vld [vmem:[%s1688_s0 + $0x10] sm:$0xff]  ;;  %v27_v49 = vld [vmem:[%s1688_s0 + $0x18] sm:$0xff]  ;;  %v28_v50 = vld [vmem:[%s1688_s0 + $0x20] sm:$0xff] }
   0x7   :  { %1311 = vmatprep.subr.bf16.mxu0 %v1447_v3  ;;  %v29_v51 = vld [vmem:[%s1688_s0 + $0x28] sm:$0xff]  ;;  %v30_v52 = vld [vmem:[%s1688_s0 + $0x30] sm:$0xff]  ;;  %v31_v53 = vld [vmem:[%s1688_s0 + $0x38] sm:$0xff] }
   0x9   :  { %1185 = vmatmul.mubr.msk.f32.vlgmr.msra.gmra.mrb[0].mxu0 %vm41_vm0, %v25_v11  ;;  %1304 = vmatpush3.bf16.msra.mxu1 %v1519_v12 }
   0xa   :  { %1313 = vmatpush3.bf16.msra.mxu0 %v1504_v7  ;;  %1305 = vmatprep.subr.bf16.mxu1 %v1447_v3 }
   0xb   :  { %1314 = vmatprep.subr.bf16.mxu0 %v1447_v3  ;;  %1187 = vmatprep.mubr.msk.f32.mxu0 %vm41_vm0, %v26_v48 }
   0xc   :  { %1205 = vmatmul.mubr.f32.vlgmr.msra.gmra.mrb[0].mxu1 %v1449_v10 }
   0xd   :  { %1307 = vmatpush3.bf16.msra.mxu1 %v1504_v7  ;;  %1215 = vmatprep.mubr.msk.f32.mxu1 %vm1448_vm1, %v1449_v10 }
   0xe   :  { %1308 = vmatprep.subr.bf16.mxu1 %v1447_v3  ;;  %1316 = vmatpush3.bf16.msra.mxu0 %v1519_v12 }
   0xf   :  { %1323 = vmatprep.subr.bf16.mxu0 %v1447_v3  ;;  %1188 = vmatmul.mubr.msk.f32.gmra.mrb[2].mxu0 %vm41_vm0, %v27_v49 }
  0x10   :  { %1190 = vmatprep.mubr.msk.f32.mxu0 %vm41_vm0, %v28_v50 }
  0x11   :  { %1310 = vmatpush3.bf16.msra.mxu1 %v1519_v12 }
  0x12   :  { %1317 = vmatprep.subr.bf16.mxu1 %v1447_v3 }
  0x13   :  { %1191 = vmatmul.mubr.msk.f32.gmra.mrb[4].mxu0 %vm41_vm0, %v29_v51 }
  0x14   :  { %1193 = vmatprep.mubr.msk.f32.mxu0 %vm41_vm0, %v30_v52 }
  0x17   :  { %1194 = vmatmul.mubr.msk.f32.gmra.mrb[6].mxu0 %vm41_vm0, %v31_v53 }
  0x18   :  { %1226 = vmatprep.mubr.msk.f32.mxu0 %vm1448_vm1, %v1449_v10 }
  0xdc   :  { %v1186_v14 = vpop.f32.mrb[0].mxu0 }
  0xdd   :  { %v132_v15 = vpop.f32.mrb[1].mxu0  ;;  %v138_v34 = vadd.f32 %v1186_v14, %v1540_v13 }
  0xde   :  { %v133_v16 = vadd.f32 %v1540_v13, %v132_v15 }
  0xdf   :  { %v254_v17 = vpop.f32.mrb[0].mxu1 }
  0xe0   :  { %v258_v18 = vadd.f32 %v254_v17, %v133_v16  ;;  %v1206_v19 = vpop.f32.mrb[1].mxu1 }
  0xe2   :  { %1359 = vtanh.f32 %v258_v18  ;;  %v1108_v21 = vmul.f32 -1.442695, %v258_v18  ;;  %v1189_v57 = vpop.f32.mrb[2].mxu0 }
  0xe3   :  { %v142_v58 = vpop.f32.mrb[3].mxu0 }
  0xe4   :  { %1361 = vpow2.f32 %v1108_v21  ;;  %v143_v0 = vadd.f32 %v1540_v13, %v142_v58 }
  0xe6   :  { %v1585_v59 = vpop.f32.mrb[4].mxu0 }
  0xe7   :  { %v1587_v60 = vpop.f32.mrb[5].mxu0 }
  0xea   :  { %v1589_v61 = vpop.f32.mrb[6].mxu0 }
  0xeb   :  { %v1591_v62 = vpop.f32.mrb[7].mxu0 }
  0xec   :  { %v1360_v20 = vpop.eup %1359 }
  0xed   :  { %268 = vrot.lane.b32.xlu0 %v1360_v20, %s1450_s13 }
  0xee   :  { %v1362_v22 = vpop.eup %1361 }
  0xef   :  { %v262_v23 = vadd.f32 1.0, %v1362_v22 }
  0xf1   :  { %1363 = vrcp.f32 %v262_v23  ;;  %v148_v23 = vadd.f32 %v1189_v57, %v1540_v13 }
  0xfb   :  { %v1364_v24 = vpop.eup %1363 }
  0xfc   :  { %v266_v27 = vmul.f32 0.0, %v1364_v24 }
 0x15f   :  { %v269_v25 = vpop.permute.xlu0 %268 }
 0x160   :  { %v271_v26 = vmul.f32 %v1364_v24, %v269_v25 }
 0x162   :  { %273 = vrot.lane.b32.xlu0 %v271_v26, %s1451_s3 }
 0x1d4   :  { %v274_v28 = vpop.permute.xlu0 %273 }
 0x1d5   :  { %v276_v29 = vadd.f32 %v274_v28, %v266_v27 }
 0x1d7   :  { %1365 = vtanh.f32 %v276_v29 }
 0x1e1   :  { %v1366_v30 = vpop.eup %1365 }
 0x1e2   :  { %279 = vrot.lane.b32.xlu1 %v1366_v30, %s1450_s13 }
 0x254   :  { %v280_v31 = vpop.permute.xlu1 %279 }
 0x255   :  { %v282_v32 = vmul.f32 %v1364_v24, %v280_v31 }
 0x257   :  { %286 = vrot.lane.b32.xlu1 %v282_v32, %s1451_s3 }
 0x2c9   :  { %v287_v33 = vpop.permute.xlu1 %286 }
 0x2ca   :  { %1216 = vmatmul.mubr.msk.f32.vlgmr.msra.gmra.mrb[2].mxu1 %vm184_vm2, %v287_v33 }
 0x2cb   :  { %1319 = vmatpush3.bf16.msra.mxu1 %v1504_v7  ;;  %1237 = vmatprep.mubr.msk.f32.mxu1 %vm1448_vm1, %v1449_v10 }
 0x2cc   :  { %1320 = vmatprep.subr.bf16.mxu1 %v1447_v3 }
 0x2cf   :  { %1322 = vmatpush3.bf16.msra.mxu1 %v1519_v12 }
 0x2d0   :  { %1329 = vmatprep.subr.bf16.mxu1 %v1447_v3 }
 0x39d   :  { %v356_v35 = vpop.f32.mrb[2].mxu1 }
 0x39e   :  { %v360_v36 = vadd.f32 %v356_v35, %v138_v34  ;;  %v1217_v37 = vpop.f32.mrb[3].mxu1 }
 0x3a0   :  { %1367 = vtanh.f32 %v360_v36  ;;  %v1110_v39 = vmul.f32 -1.442695, %v360_v36 }
 0x3a2   :  { %1369 = vpow2.f32 %v1110_v39 }
 0x3aa   :  { %v1368_v38 = vpop.eup %1367 }
 0x3ab   :  { %370 = vrot.lane.b32.xlu0 %v1368_v38, %s1450_s13 }
 0x3ac   :  { %v1370_v40 = vpop.eup %1369 }
 0x3ad   :  { %v364_v41 = vadd.f32 1.0, %v1370_v40 }
 0x3af   :  { %1371 = vrcp.f32 %v364_v41  ;;  %v153_v41 = vadd.f32 %v1540_v13, %v1587_v60  ;;  %v158_v60 = vadd.f32 %v1585_v59, %v1540_v13 }
 0x3b9   :  { %v1372_v42 = vpop.eup %1371 }
 0x3ba   :  { %v368_v45 = vmul.f32 %v1372_v42, %v276_v29 }
 0x41d   :  { %v371_v43 = vpop.permute.xlu0 %370 }
 0x41e   :  { %v373_v44 = vmul.f32 %v1372_v42, %v371_v43 }
 0x420   :  { %375 = vrot.lane.b32.xlu1 %v373_v44, %s1451_s3 }
 0x492   :  { %v376_v46 = vpop.permute.xlu1 %375 }
 0x493   :  { %v378_v47 = vadd.f32 %v376_v46, %v368_v45 }
 0x495   :  { %1373 = vtanh.f32 %v378_v47 }
 0x49f   :  { %v1374_v54 = vpop.eup %1373 }
 0x4a0   :  { %381 = vrot.lane.b32.xlu0 %v1374_v54, %s1450_s13 }
 0x512   :  { %v382_v55 = vpop.permute.xlu0 %381 }
 0x513   :  { %v384_v56 = vmul.f32 %v1372_v42, %v382_v55 }
 0x515   :  { %388 = vrot.lane.b32.xlu1 %v384_v56, %s1451_s3 }
 0x587   :  { %v389_v63 = vpop.permute.xlu1 %388 }
 0x588   :  { %1227 = vmatmul.mubr.msk.f32.vlgmr.msra.gmra.mrb[8].mxu0 %vm184_vm2, %v389_v63 }
 0x589   :  { %1325 = vmatpush3.bf16.msra.mxu0 %v1504_v7  ;;  %1248 = vmatprep.mubr.msk.f32.mxu0 %vm1448_vm1, %v1449_v10 }
 0x58a   :  { %1326 = vmatprep.subr.bf16.mxu0 %v1447_v3 }
 0x58d   :  { %1328 = vmatpush3.bf16.msra.mxu0 %v1519_v12 }
 0x58e   :  { %1335 = vmatprep.subr.bf16.mxu0 %v1447_v3 }
 0x65b   :  { %v458_v1 = vpop.f32.mrb[8].mxu0 }
 0x65c   :  { %v462_v2 = vadd.f32 %v458_v1, %v143_v0  ;;  %v1228_v4 = vpop.f32.mrb[9].mxu0 }
 0x65e   :  { %1375 = vtanh.f32 %v462_v2  ;;  %v1112_v6 = vmul.f32 -1.442695, %v462_v2 }
 0x660   :  { %1377 = vpow2.f32 %v1112_v6 }
 0x668   :  { %v1376_v5 = vpop.eup %1375 }
 0x669   :  { %472 = vrot.lane.b32.xlu0 %v1376_v5, %s1450_s13 }
 0x66a   :  { %v1378_v8 = vpop.eup %1377 }
 0x66b   :  { %v466_v9 = vadd.f32 1.0, %v1378_v8 }
 0x66d   :  { %1379 = vrcp.f32 %v466_v9 }
 0x677   :  { %v1380_v11 = vpop.eup %1379 }
 0x678   :  { %v470_v16 = vmul.f32 %v1380_v11, %v378_v47 }
 0x6db   :  { %v473_v14 = vpop.permute.xlu0 %472 }
 0x6dc   :  { %v475_v15 = vmul.f32 %v1380_v11, %v473_v14 }
 0x6de   :  { %477 = vrot.lane.b32.xlu1 %v475_v15, %s1451_s3 }
 0x750   :  { %v478_v17 = vpop.permute.xlu1 %477 }
 0x751   :  { %v480_v18 = vadd.f32 %v478_v17, %v470_v16 }
 0x753   :  { %1381 = vtanh.f32 %v480_v18 }
 0x75d   :  { %v1382_v19 = vpop.eup %1381 }
 0x75e   :  { %483 = vrot.lane.b32.xlu0 %v1382_v19, %s1450_s13 }
 0x7d0   :  { %v484_v20 = vpop.permute.xlu0 %483 }
 0x7d1   :  { %v486_v21 = vmul.f32 %v1380_v11, %v484_v20 }
 0x7d3   :  { %490 = vrot.lane.b32.xlu1 %v486_v21, %s1451_s3 }
 0x845   :  { %v491_v22 = vpop.permute.xlu1 %490 }
 0x846   :  { %1238 = vmatmul.mubr.msk.f32.vlgmr.msra.gmra.mrb[4].mxu1 %vm184_vm2, %v491_v22 }
 0x847   :  { %1331 = vmatpush3.bf16.msra.mxu1 %v1504_v7  ;;  %1259 = vmatprep.mubr.msk.f32.mxu1 %vm1448_vm1, %v1449_v10 }
 0x848   :  { %1332 = vmatprep.subr.bf16.mxu1 %v1447_v3 }
 0x84b   :  { %1334 = vmatpush3.bf16.msra.mxu1 %v1519_v12 }
 0x84c   :  { %1341 = vmatprep.subr.bf16.mxu1 %v1447_v3 }
 0x919   :  { %v560_v24 = vpop.f32.mrb[4].mxu1 }
 0x91a   :  { %v564_v25 = vadd.f32 %v560_v24, %v148_v23  ;;  %v1239_v26 = vpop.f32.mrb[5].mxu1 }
 0x91c   :  { %1383 = vtanh.f32 %v564_v25  ;;  %v1114_v28 = vmul.f32 -1.442695, %v564_v25 }
 0x91e   :  { %1385 = vpow2.f32 %v1114_v28 }
 0x926   :  { %v1384_v27 = vpop.eup %1383 }
 0x927   :  { %574 = vrot.lane.b32.xlu0 %v1384_v27, %s1450_s13 }
 0x928   :  { %v1386_v29 = vpop.eup %1385 }
 0x929   :  { %v568_v30 = vadd.f32 1.0, %v1386_v29 }
 0x92b   :  { %1387 = vrcp.f32 %v568_v30 }
 0x935   :  { %v1388_v31 = vpop.eup %1387 }
 0x936   :  { %v572_v34 = vmul.f32 %v1388_v31, %v480_v18  ;;  %v163_v18 = vadd.f32 %v1540_v13, %v1591_v62 }
 0x999   :  { %v575_v32 = vpop.permute.xlu0 %574 }
 0x99a   :  { %v577_v33 = vmul.f32 %v1388_v31, %v575_v32 }
 0x99c   :  { %579 = vrot.lane.b32.xlu1 %v577_v33, %s1451_s3 }
 0xa0e   :  { %v580_v35 = vpop.permute.xlu1 %579 }
 0xa0f   :  { %v582_v36 = vadd.f32 %v580_v35, %v572_v34  ;;  %v168_v34 = vadd.f32 %v1589_v61, %v1540_v13  ;;  %v998_v61 = vld [vmem:[%s1692_s4] sm:$0xff] }
 0xa11   :  { %1389 = vtanh.f32 %v582_v36 }
 0xa1b   :  { %v1390_v37 = vpop.eup %1389 }
 0xa1c   :  { %585 = vrot.lane.b32.xlu0 %v1390_v37, %s1450_s13 }
 0xa8e   :  { %v586_v38 = vpop.permute.xlu0 %585 }
 0xa8f   :  { %v588_v39 = vmul.f32 %v1388_v31, %v586_v38 }
 0xa91   :  { %592 = vrot.lane.b32.xlu1 %v588_v39, %s1451_s3 }
 0xb03   :  { %v593_v40 = vpop.permute.xlu1 %592 }
 0xb04   :  { %1249 = vmatmul.mubr.msk.f32.vlgmr.msra.gmra.mrb[10].mxu0 %vm184_vm2, %v593_v40 }
 0xb05   :  { %1337 = vmatpush3.bf16.msra.mxu0 %v1504_v7  ;;  %1270 = vmatprep.mubr.msk.f32.mxu0 %vm1448_vm1, %v1449_v10 }
 0xb06   :  { %1338 = vmatprep.subr.bf16.mxu0 %v1447_v3 }
 0xb09   :  { %1340 = vmatpush3.bf16.msra.mxu0 %v1519_v12 }
 0xb0a   :  { %1347 = vmatprep.subr.bf16.mxu0 %v1447_v3 }
 0xbd7   :  { %v662_v42 = vpop.f32.mrb[10].mxu0 }
 0xbd8   :  { %v666_v43 = vadd.f32 %v662_v42, %v153_v41  ;;  %v1250_v44 = vpop.f32.mrb[11].mxu0 }
 0xbda   :  { %1391 = vtanh.f32 %v666_v43  ;;  %v1116_v46 = vmul.f32 -1.442695, %v666_v43 }
 0xbdc   :  { %1393 = vpow2.f32 %v1116_v46 }
 0xbe4   :  { %v1392_v45 = vpop.eup %1391 }
 0xbe5   :  { %676 = vrot.lane.b32.xlu0 %v1392_v45, %s1450_s13 }
 0xbe6   :  { %v1394_v47 = vpop.eup %1393 }
 0xbe7   :  { %v670_v48 = vadd.f32 1.0, %v1394_v47  ;;  %v999_v47 = vld [vmem:[%s1692_s4 + $0x8] sm:$0xff] }
 0xbe9   :  { %1395 = vrcp.f32 %v670_v48  ;;  %v1000_v48 = vld [vmem:[%s1692_s4 + $0x10] sm:$0xff] }
 0xbf3   :  { %v1396_v49 = vpop.eup %1395 }
 0xbf4   :  { %v674_v52 = vmul.f32 %v1396_v49, %v582_v36 }
 0xc57   :  { %v677_v50 = vpop.permute.xlu0 %676 }
 0xc58   :  { %v679_v51 = vmul.f32 %v1396_v49, %v677_v50  ;;  %v1001_v50 = vld [vmem:[%s1692_s4 + $0x18] sm:$0xff]  ;;  %s1452_s4 = smov [#allocation3]  }
 0xc59   :  { %s1091_s10 = sshll.u32 %s1452_s4, 4  ;;  %s1092_s10 = int_to_ptr.vmem [resolvable:$true] %s1091_s10 }
 0xc5a   :  { %681 = vrot.lane.b32.xlu1 %v679_v51, %s1451_s3  ;;  %v1351_v51 = vpack.c.bf16 %v1001_v50, %v1000_v48  ;;  %s1423_s11 = scalar_lea.vmem %s1092_s10, 128  ;;  %p1428_p1 = scmp.lt.s32.totalorder %s1092_s10, %s1092_s10 }
 0xc5b   :  { %p1424_p0 = scmp.ne.s32.totalorder %s1092_s10, %s1423_s11  ;;  %p1429_p2 = scmp.lt.s32.totalorder %s1423_s11, %s1423_s11 }
 0xc5d   :  { %p1430_p3 = por %p1429_p2, %p1428_p1 }
 0xc5f   :  { %p1431_p4 = pnand %p1430_p3, %p1424_p0 }
 0xccc   :  { %v682_v53 = vpop.permute.xlu1 %681 }
 0xccd   :  { %v684_v54 = vadd.f32 %v682_v53, %v674_v52 }
 0xccf   :  { %1397 = vtanh.f32 %v684_v54 }
 0xcd9   :  { %v1398_v55 = vpop.eup %1397 }
 0xcda   :  { %687 = vrot.lane.b32.xlu0 %v1398_v55, %s1450_s13 }
 0xd4c   :  { %v688_v56 = vpop.permute.xlu0 %687 }
 0xd4d   :  { %v690_v57 = vmul.f32 %v1396_v49, %v688_v56  ;;  %v1348_v49 = vpack.c.bf16 %v999_v47, %v998_v61 }
 0xd4f   :  { %694 = vrot.lane.b32.xlu1 %v690_v57, %s1451_s3  ;;  %v1123_v57 = vld [vmem:[%s1693_s5] ss:$0 sm:$0xff] }
 0xdc1   :  { %v695_v58 = vpop.permute.xlu1 %694 }
 0xdc2   :  { %1260 = vmatmul.mubr.msk.f32.vlgmr.msra.gmra.mrb[6].mxu1 %vm184_vm2, %v695_v58 }
 0xdc3   :  { %1343 = vmatpush3.bf16.msra.mxu1 %v1504_v7  ;;  %1281 = vmatprep.mubr.msk.f32.mxu1 %vm1448_vm1, %v1449_v10 }
 0xdc4   :  { %1344 = vmatprep.subr.bf16.mxu1 %v1447_v3 }
 0xdc7   :  { %1346 = vmatpush3.bf16.msra.mxu1 %v1519_v12 }
 0xe95   :  { %v764_v63 = vpop.f32.mrb[6].mxu1 }
 0xe96   :  { %v768_v0 = vadd.f32 %v764_v63, %v158_v60  ;;  %v1261_v1 = vpop.f32.mrb[7].mxu1 }
 0xe98   :  { %1399 = vtanh.f32 %v768_v0  ;;  %v1118_v4 = vmul.f32 -1.442695, %v768_v0 }
 0xe9a   :  { %1401 = vpow2.f32 %v1118_v4 }
 0xea2   :  { %v1400_v2 = vpop.eup %1399 }
 0xea3   :  { %778 = vrot.lane.b32.xlu0 %v1400_v2, %s1450_s13 }
 0xea4   :  { %v1402_v7 = vpop.eup %1401 }
 0xea5   :  { %v772_v5 = vadd.f32 1.0, %v1402_v7 }
 0xea7   :  { %1403 = vrcp.f32 %v772_v5 }
 0xeb1   :  { %v1404_v6 = vpop.eup %1403 }
 0xeb2   :  { %v776_v12 = vmul.f32 %v1404_v6, %v684_v54 }
 0xf15   :  { %v779_v8 = vpop.permute.xlu0 %778 }
 0xf16   :  { %v781_v9 = vmul.f32 %v1404_v6, %v779_v8 }
 0xf18   :  { %783 = vrot.lane.b32.xlu1 %v781_v9, %s1451_s3 }
 0xf8a   :  { %v784_v11 = vpop.permute.xlu1 %783 }
 0xf8b   :  { %v786_v59 = vadd.f32 %v784_v11, %v776_v12 }
 0xf8d   :  { %1405 = vtanh.f32 %v786_v59 }
 0xf97   :  { %v1406_v14 = vpop.eup %1405 }
 0xf98   :  { %789 = vrot.lane.b32.xlu0 %v1406_v14, %s1450_s13 }
0x100a   :  { %v790_v15 = vpop.permute.xlu0 %789 }
0x100b   :  { %v792_v16 = vmul.f32 %v1404_v6, %v790_v15 }
0x100d   :  { %796 = vrot.lane.b32.xlu1 %v792_v16, %s1451_s3 }
0x107f   :  { %v797_v17 = vpop.permute.xlu1 %796 }
0x1080   :  { %1271 = vmatmul.mubr.msk.f32.vlgmr.msra.gmra.mrb[12].mxu0 %vm184_vm2, %v797_v17 }
0x1081   :  { %1292 = vmatprep.mubr.msk.f32.mxu0 %vm1448_vm1, %v1449_v10  ;;  %1349 = vmatpush3.bf16.msra.mxu0 %v1348_v49 }
0x1082   :  { %1350 = vmatprep.subr.bf16.mxu0 %v1447_v3 }
0x1085   :  { %1352 = vmatpush3.bf16.msra.mxu0 %v1351_v51 }
0x1153   :  { %v866_v19 = vpop.f32.mrb[12].mxu0 }
0x1154   :  { %v870_v20 = vadd.f32 %v866_v19, %v163_v18  ;;  %v1272_v21 = vpop.f32.mrb[13].mxu0 }
0x1156   :  { %1407 = vtanh.f32 %v870_v20  ;;  %v1120_v23 = vmul.f32 -1.442695, %v870_v20 }
0x1158   :  { %1409 = vpow2.f32 %v1120_v23 }
0x1160   :  { %v1408_v22 = vpop.eup %1407 }
0x1161   :  { %880 = vrot.lane.b32.xlu0 %v1408_v22, %s1450_s13 }
0x1162   :  { %v1410_v24 = vpop.eup %1409 }
0x1163   :  { %v874_v25 = vadd.f32 1.0, %v1410_v24 }
0x1165   :  { %1411 = vrcp.f32 %v874_v25 }
0x116f   :  { %v1412_v26 = vpop.eup %1411 }
0x1170   :  { %v878_v10 = vmul.f32 %v1412_v26, %v786_v59 }
0x11d3   :  { %v881_v27 = vpop.permute.xlu0 %880 }
0x11d4   :  { %v883_v28 = vmul.f32 %v1412_v26, %v881_v27 }
0x11d6   :  { %885 = vrot.lane.b32.xlu1 %v883_v28, %s1451_s3 }
0x1248   :  { %v886_v29 = vpop.permute.xlu1 %885 }
0x1249   :  { %v888_v62 = vadd.f32 %v886_v29, %v878_v10 }
0x124b   :  { %1413 = vtanh.f32 %v888_v62 }
0x1255   :  { %v1414_v30 = vpop.eup %1413 }
0x1256   :  { %891 = vrot.lane.b32.xlu0 %v1414_v30, %s1450_s13 }
0x12c8   :  { %v892_v31 = vpop.permute.xlu0 %891 }
0x12c9   :  { %v894_v32 = vmul.f32 %v1412_v26, %v892_v31 }
0x12cb   :  { %898 = vrot.lane.b32.xlu1 %v894_v32, %s1451_s3 }
0x133d   :  { %v899_v33 = vpop.permute.xlu1 %898 }
0x133e   :  { %1282 = vmatmul.mubr.msk.f32.vlgmr.msra.gmra.mrb[8].mxu1 %vm184_vm2, %v899_v33 }
0x1411   :  { %v968_v35 = vpop.f32.mrb[8].mxu1 }
0x1412   :  { %v972_v36 = vadd.f32 %v968_v35, %v168_v34  ;;  %v1283_v37 = vpop.f32.mrb[9].mxu1 }
0x1414   :  { %1415 = vtanh.f32 %v972_v36  ;;  %v1122_v39 = vmul.f32 -1.442695, %v972_v36 }
0x1416   :  { %1417 = vpow2.f32 %v1122_v39 }
0x141e   :  { %v1416_v38 = vpop.eup %1415 }
0x141f   :  { %982 = vrot.lane.b32.xlu0 %v1416_v38, %s1450_s13 }
0x1420   :  { %v1418_v40 = vpop.eup %1417 }
0x1421   :  { %v976_v41 = vadd.f32 1.0, %v1418_v40 }
0x1423   :  { %1419 = vrcp.f32 %v976_v41 }
0x142d   :  { %v1420_v42 = vpop.eup %1419 }
0x142e   :  { %v980_v45 = vmul.f32 %v1420_v42, %v888_v62 }
0x1491   :  { %v983_v43 = vpop.permute.xlu0 %982 }
0x1492   :  { %v985_v44 = vmul.f32 %v1420_v42, %v983_v43 }
0x1494   :  { %987 = vrot.lane.b32.xlu1 %v985_v44, %s1451_s3 }
0x1506   :  { %v988_v46 = vpop.permute.xlu1 %987 }
0x1507   :  { %v990_v13 = vadd.f32 %v988_v46, %v980_v45 }
0x1509   :  { %1421 = vtanh.f32 %v990_v13 }
0x1513   :  { %v1422_v52 = vpop.eup %1421 }
0x1514   :  { %993 = vrot.lane.b32.xlu0 %v1422_v52, %s1450_s13 }
0x1586   :  { %v994_v53 = vpop.permute.xlu0 %993 }
0x1587   :  { %v996_v54 = vmul.f32 %v1420_v42, %v994_v53 }
0x1589   :  { %v997_v55 = vmax.f32 %v996_v54, 0.0 }
0x158b   :  { %1010 = vrot.lane.b32.xlu1 %v997_v55, %s1451_s3 }
0x15fd   :  { %v1011_v56 = vpop.permute.xlu1 %1010 }
0x15fe   :  { %1293 = vmatmul.mubr.msk.f32.vlgmr.msra.gmra.mrb[14].mxu0 %vm184_vm2, %v1011_v56 }
0x16d1   :  { %v1080_v58 = vpop.f32.mrb[14].mxu0 }
0x16d2   :  { %v1081_v3 = vadd.f32 %v1123_v57, %v1080_v58  ;;  %v1294_v60 = vpop.f32.mrb[15].mxu0 }
0x16d4   :  { %1084 = vst.msk [vmem:[#allocation3] sm:$0xff] %vm41_vm0, %v1081_v3 }
0x16d5   :  { %1434 = shalt.err (!%p1431_p4)
}
0x16d6   :  { %s1435_s13 = scalar_lea.hbm %s1694_s6, 128 }
0x16d7   :  { %p1436_p5 = scmp.ne.s32.totalorder %s1694_s6, %s1435_s13  ;;  %p1439_p6 = scmp.lt.u32.totalorder %s1435_s13, %s1694_s6 }
0x16d9   :  { %p1441_p7 = pnand %p1439_p6, %p1436_p5 }
0x16db   :  { %1444 = shalt.err (!%p1441_p7)
}
0x16dc   :  { %1094 = dma.vmem_to_hbm [thread:$0]  %s1092_s10, 128, %s1694_s6, [#allocation4]  }
0x16dd   :  { %1445 = dma.done.wait [#allocation4], 128  }
0x16de   :  { %1446 = vsyncadd [#allocation4], 4294967168 }
0x16df   :  { %1098 = vsyncpa [#allocation4], 1 }

</bundles_post_ra>
